<compile_context>
chip_gen: v6e
topology: v6e:2x2x1
jax: 0.10.0
libtpu: 0.0.40
codegen_flags: <defaults>
</compile_context>

<pallas_src>
import functools

import jax
import jax.numpy as jnp
from jax.experimental import pallas as pl
from jax.experimental.pallas import tpu as pltpu

_LANE = 128
_MIN_SPLIT_BYTES = 2 << 20   # don't shrink row tiles below ~2 MiB just for megacore steps


def _round_up(x, m):
    return ((x + m - 1) // m) * m


def _cdiv(a, b):
    return -(-a // b)


def _vmem_capacity_bytes():
    """Per-core VMEM capacity; conservative 64 MiB fallback (v7x) if unknown."""
    try:
        cap = int(pltpu.get_tpu_info().vmem_capacity_bytes)
        if cap > 0:
            return cap
    except Exception:
        pass
    return 64 * 1024 * 1024


def _validate_tile(name, t, full):
    """User-supplied tiles must be a multiple of 128 or the full extent."""
    if t is None:
        return None
    t = int(t)
    if t <= 0:
        raise ValueError(f"{name} must be positive, got {t}")
    t = min(t, full)
    if t != full and t % _LANE != 0:
        raise ValueError(
            f"{name}={t} must be a multiple of {_LANE} or the full extent {full}")
    return t


def _select_tiles(R, HW, itemsize, block_budget):
    """Pick (r_tile, hw_tile).

    Constraints ((8,128) tiling + lane-dense (1, r_tile) output block):
      r_tile  % 128 == 0  or  r_tile  == R
      hw_tile % 128 == 0  or  hw_tile == HW
    """
    hw_padded = max(_round_up(HW, _LANE), _LANE)
    row_bytes = hw_padded * itemsize
    r_min = R if R < _LANE else _LANE

    if r_min * row_bytes > block_budget:
        # Even the smallest legal row tile with full HW blows the budget
        # (huge spatial extent): tile the reduction axis too.
        r_tile = r_min
        hw_tile = max(_LANE, (block_budget // (r_tile * itemsize)) // _LANE * _LANE)
        if hw_tile >= HW:
            return r_tile, HW
        return r_tile, hw_tile

    # Full HW per block; largest row tile that fits the budget.
    r_fit = block_budget // row_bytes
    if r_fit >= R:
        r_tile = R
    else:
        r_tile = max(_LANE, (r_fit // _LANE) * _LANE)

    # Megacore (v7x): keep >= ~8 row tiles as long as each tile stays large
    # enough that per-step overhead remains negligible.
    while _cdiv(R, r_tile) < 8:
        half = (r_tile // 2 // _LANE) * _LANE
        if half < _LANE or half * row_bytes < _MIN_SPLIT_BYTES:
            break
        r_tile = half

    return r_tile, HW


def _gap_kernel(x_ref, o_ref, acc_ref, *, inv_hw, hw, hw_tile, mask_hw):
    # x_ref: (r_tile, hw_tile) VMEM; o_ref: (1, r_tile) VMEM; acc_ref: (1, r_tile) f32.
    k = pl.program_id(1)

    @pl.when(k == 0)
    def _():
        acc_ref[...] = jnp.zeros_like(acc_ref)

    x = x_ref[...]
    if mask_hw:
        # Final partial HW block: zero out-of-range lanes before reducing.
        col = jax.lax.broadcasted_iota(jnp.int32, x.shape, 1)
        valid = hw - k * hw_tile
        x = jnp.where(col < valid, x, jnp.zeros_like(x))

    # Fused f32 accumulation; no full-tile f32 temporary for bf16 inputs.
    acc_ref[...] += jnp.sum(x, axis=-1, dtype=jnp.float32)[None, :]

    @pl.when(k == pl.num_programs(1) - 1)
    def _():
        o_ref[...] = (acc_ref[...] * inv_hw).astype(o_ref.dtype)


def global_avg_pool2d(x, *, r_tile=None, hw_tile=None):
    """x: (N, C, H, W) -> (N, C, 1, 1); mean over H, W.

    Matches F.avg_pool2d(x, kernel_size=x.size()[2:]).
    """
    N, C, H, W = x.shape
    R = N * C
    HW = H * W
    itemsize = jnp.dtype(x.dtype).itemsize

    # Free metadata reshape for contiguous NCHW: each row is one (n, c) image.
    x2 = x.reshape(R, HW)

    vmem_cap = _vmem_capacity_bytes()
    block_budget = min(vmem_cap // 4, 32 * 1024 * 1024)

    auto_r, auto_hw = _select_tiles(R, HW, itemsize, block_budget)
    r_tile = _validate_tile("r_tile", r_tile, R) or auto_r
    hw_tile = _validate_tile("hw_tile", hw_tile, HW) or auto_hw

    grid_r = _cdiv(R, r_tile)
    grid_k = _cdiv(HW, hw_tile)
    needs_mask = (grid_k > 1) and (HW % hw_tile != 0)

    block_bytes = r_tile * max(_round_up(hw_tile, _LANE), _LANE) * itemsize
    n_steps = grid_r * grid_k
    buffer_count = 3 if (block_bytes <= (4 << 20) and n_steps >= 4) else 2

    if buffer_count > 2:
        try:
            in_spec = pl.BlockSpec((r_tile, hw_tile), lambda r, k: (r, k),
                                   pipeline_mode=pl.Buffered(buffer_count))
        except TypeError:  # older BlockSpec signature: fall back to default depth
            buffer_count = 2
            in_spec = pl.BlockSpec((r_tile, hw_tile), lambda r, k: (r, k))
    else:
        in_spec = pl.BlockSpec((r_tile, hw_tile), lambda r, k: (r, k))

    vmem_limit = int(min(vmem_cap * 3 // 4,
                         max(32 << 20, buffer_count * block_bytes + (8 << 20))))

    kernel = functools.partial(
        _gap_kernel,
        inv_hw=1.0 / float(HW),
        hw=HW,
        hw_tile=hw_tile,
        mask_hw=needs_mask,
    )

    out2 = pl.pallas_call(
        kernel,
        out_shape=jax.ShapeDtypeStruct((1, R), x.dtype),
        grid_spec=pltpu.PrefetchScalarGridSpec(
            num_scalar_prefetch=0,
            grid=(grid_r, grid_k),
            in_specs=[in_spec],
            # Lane-dense output block: (1, r_tile) with rows on the lane dim.
            out_specs=pl.BlockSpec((1, r_tile), lambda r, k: (0, r)),
            scratch_shapes=[pltpu.VMEM((1, r_tile), jnp.float32)],
        ),
        compiler_params=pltpu.CompilerParams(
            dimension_semantics=("parallel", "arbitrary"),
            vmem_limit_bytes=vmem_limit,
        ),
    )(x2)

    return out2.reshape(N, C, 1, 1)


def _ref_gap(x):
    return jnp.mean(x.astype(jnp.float32), axis=(2, 3), keepdims=True).astype(x.dtype)


if __name__ == "__main__":
    key = jax.random.PRNGKey(0)
    k0, k1, k2, k3 = jax.random.split(key, 4)

    # 1) Primary spec-sized case: small NCHW fp32 (single block, grid (1,1)).
    x = jax.random.normal(k0, (2, 4, 16, 16), dtype=jnp.float32)
    out = jax.block_until_ready(global_avg_pool2d(x))
    ref = _ref_gap(x)
    assert out.shape == (2, 4, 1, 1), out.shape
    assert jnp.allclose(out, ref, atol=1e-6, rtol=1e-6), "fp32 mismatch vs reference"

    # 2) bf16 with non-multiple-of-128 spatial extent (H*W = 49), full-HW block.
    xb = jax.random.normal(k1, (2, 8, 7, 7), dtype=jnp.float32).astype(jnp.bfloat16)
    outb = jax.block_until_ready(global_avg_pool2d(xb))
    refb = _ref_gap(xb)
    assert outb.shape == (2, 8, 1, 1), outb.shape
    assert jnp.allclose(outb.astype(jnp.float32), refb.astype(jnp.float32),
                        atol=1e-2, rtol=1e-2), "bf16 mismatch vs reference"

    # 3) Row-tiled path (flattened N*C rows, r_tile=128, 8 grid steps, Buffered(3)).
    xc = jax.random.normal(k2, (2, 512, 8, 8), dtype=jnp.float32)
    outc = jax.block_until_ready(global_avg_pool2d(xc, r_tile=128))
    refc = _ref_gap(xc)
    assert outc.shape == (2, 512, 1, 1), outc.shape
    assert jnp.allclose(outc, refc, atol=1e-5, rtol=1e-5), "row-tiled mismatch vs reference"

    # 4) HW-tiled reduction with a partial (masked) final block: HW=200, hw_tile=128.
    xd = jax.random.normal(k3, (1, 8, 10, 20), dtype=jnp.float32)
    outd = jax.block_until_ready(global_avg_pool2d(xd, hw_tile=128))
    refd = _ref_gap(xd)
    assert outd.shape == (1, 8, 1, 1), outd.shape
    assert jnp.allclose(outd, refd, atol=1e-5, rtol=1e-5), "hw-tiled mismatch vs reference"

    print("KERNEL_OK")
</pallas_src>

<mosaic_0001>
module attributes {stable_mosaic.version = 11 : i64} {
  func.func @_gap_kernel(%arg0: i32, %arg1: i32, %arg2: memref<8x256xf32, #tpu.memory_space<vmem>>, %arg3: memref<1x8xf32, #tpu.memory_space<vmem>>, %arg4: memref<1x8xf32, #tpu.memory_space<vmem>>) attributes {dimension_semantics = [#tpu.dimension_semantics<parallel>, #tpu.dimension_semantics<arbitrary>], iteration_bounds = array<i64: 1, 1>, scalar_prefetch = 0 : i64, scratch_operands = 1 : i64, tpu.core_type = #tpu.core_type<tc>, window_params = [{transform_indices = @transform_0, window_bounds = array<i64: 8, 256>}, {transform_indices = @transform_1, window_bounds = array<i64: 1, 8>}]} {
    %c0_i32 = arith.constant 0 : i32
    %0 = arith.cmpi eq, %arg1, %c0_i32 : i32
    %1 = arith.extui %0 : i1 to i32
    %c0_i32_0 = arith.constant 0 : i32
    %2 = arith.cmpi ne, %1, %c0_i32_0 : i32
    scf.if %2 {
      %cst_8 = arith.constant 0.000000e+00 : f32
      %12 = vector.broadcast %cst_8 : f32 to vector<1x8xf32>
      %c0_9 = arith.constant 0 : index
      %c0_10 = arith.constant 0 : index
      %13 = vector.load %arg4[%c0_9, %c0_10] : memref<1x8xf32, #tpu.memory_space<vmem>>, vector<1x8xf32>
      tpu.vector_store %arg4[%c0_9, %c0_10], %12 {strides = array<i32>} : memref<1x8xf32, #tpu.memory_space<vmem>>, vector<1x8xf32>,
    } else {
    }
    %c0 = arith.constant 0 : index
    %c0_1 = arith.constant 0 : index
    %3 = vector.load %arg2[%c0, %c0_1] : memref<8x256xf32, #tpu.memory_space<vmem>>, vector<8x256xf32>
    %c0_2 = arith.constant 0 : index
    %c0_3 = arith.constant 0 : index
    %4 = vector.load %arg4[%c0_2, %c0_3] : memref<1x8xf32, #tpu.memory_space<vmem>>, vector<1x8xf32>
    %cst = arith.constant dense<0.000000e+00> : vector<8xf32>
    %5 = vector.multi_reduction <add>, %3, %cst [1] : vector<8x256xf32> to vector<8xf32>
    %6 = vector.shape_cast %5 : vector<8xf32> to vector<1x8xf32>
    %7 = arith.addf %4, %6 : vector<1x8xf32>
    %c0_4 = arith.constant 0 : index
    %c0_5 = arith.constant 0 : index
    %8 = vector.load %arg4[%c0_4, %c0_5] : memref<1x8xf32, #tpu.memory_space<vmem>>, vector<1x8xf32>
    tpu.vector_store %arg4[%c0_4, %c0_5], %7 {strides = array<i32>} : memref<1x8xf32, #tpu.memory_space<vmem>>, vector<1x8xf32>,
    %c0_i32_6 = arith.constant 0 : i32
    %9 = arith.cmpi eq, %arg1, %c0_i32_6 : i32
    %10 = arith.extui %9 : i1 to i32
    %c0_i32_7 = arith.constant 0 : i32
    %11 = arith.cmpi ne, %10, %c0_i32_7 : i32
    scf.if %11 {
      %c0_8 = arith.constant 0 : index
      %c0_9 = arith.constant 0 : index
      %12 = vector.load %arg4[%c0_8, %c0_9] : memref<1x8xf32, #tpu.memory_space<vmem>>, vector<1x8xf32>
      %cst_10 = arith.constant 3.906250e-03 : f32
      %13 = vector.broadcast %cst_10 : f32 to vector<1x8xf32>
      %14 = arith.mulf %12, %13 : vector<1x8xf32>
      %c0_11 = arith.constant 0 : index
      %c0_12 = arith.constant 0 : index
      %15 = vector.load %arg3[%c0_11, %c0_12] : memref<1x8xf32, #tpu.memory_space<vmem>>, vector<1x8xf32>
      tpu.vector_store %arg3[%c0_11, %c0_12], %14 {strides = array<i32>} : memref<1x8xf32, #tpu.memory_space<vmem>>, vector<1x8xf32>,
    } else {
    }
    return
  }
  func.func @transform_0(%arg0: i32, %arg1: i32) -> (i32, i32) {
    %c0_i32 = arith.constant 0 : i32
    return %arg0, %arg1 : i32, i32
  }
  func.func @transform_1(%arg0: i32, %arg1: i32) -> (i32, i32) {
    %c0_i32 = arith.constant 0 : i32
    %c0_i32_0 = arith.constant 0 : i32
    return %c0_i32, %arg0 : i32, i32
  }
}

</mosaic_0001>

<bundles_post_ra>
// kernel: tpu_custom_call.1
= control target key start
LH: loop header
LB: loop body
LE: loop exit
PB: predicated region body
PF: predicated region fallthrough
CT: control target
= control target key end

     0   :  { %6 = vsyncpa [#allocation4], 0  ;;  %s237_s0 = inlined_call_operand.hbm [shape: f32[8,256], index: 0, kind: input, shape index: {}]   ;;  %s238_s1 = inlined_call_operand.hbm [shape: f32[1,8], index: 1, kind: output, shape index: {}]  }
   0x1   :  { %7 = vsyncpa [#allocation5], 0  ;;  %s213_s6 = smov [#allocation3]  }
   0x2   :  { %s14_s7 = sshll.u32 %s213_s6, 4  ;;  %s15_s7 = int_to_ptr.vmem [resolvable:$true] %s14_s7 }
   0x3   :  { %s177_s8 = scalar_lea.vmem %s15_s7, 256  ;;  %p182_p1 = scmp.lt.s32.totalorder %s15_s7, %s15_s7 }
   0x4   :  { %p178_p0 = scmp.ne.s32.totalorder %s15_s7, %s177_s8  ;;  %p183_p2 = scmp.lt.s32.totalorder %s177_s8, %s177_s8 }
   0x6   :  { %p184_p3 = por %p183_p2, %p182_p1 }
   0x8   :  { %p185_p4 = pnand %p184_p3, %p178_p0 }
   0xa   :  { %188 = shalt.err (!%p185_p4)
}
   0xb   :  { %17 = dma.hbm_to_vmem [thread:$0]  %s237_s0, 256, %s15_s7, [#allocation4]  }
   0xc   :  { %209 = dma.done.wait [#allocation4], 256  }
   0xd   :  { %210 = vsyncadd [#allocation4], 4294967040  ;;  %v27_v0 = vld [vmem:[#allocation3] sm:$0xff]  ;;  %v28_v1 = vld [vmem:[#allocation3 + $0x8] sm:$0xff]  ;;  %v214_v3 = vmov 0   ;;  %v34_v4 = vlaneseq  ;;  %vm25_vm0 = vcmask 57344  }
   0xe   :  { %v30_v2 = vadd.f32 %v28_v1, %v27_v0  ;;  %168 = vset.pattern.permute.xlu0 %v214_v3  ;;  %v215_v8 = vmov 1966171168   ;;  %v216_v39 = vmov 0.0   ;;  %s217_s0 = smov [#allocation6]  }
   0xf   :  { %v35_v5 = vshrl.u32 %v34_v4, 7  ;;  %v119_v6 = vand.u32 127, %v34_v4  ;;  %v71_v9 = vunpack.c.l.s4 %v215_v8  ;;  %26 = vst.msk [vmem:[#allocation2] sm:$0x1] %vm25_vm0, %v216_v39  ;;  %s154_s11 = sshll.u32 %s217_s0, 4  ;;  %s155_s11 = int_to_ptr.vmem [resolvable:$true] %s154_s11 }
  0x10   :  { %31 = vadd.xlane.f32.xlu0 %v30_v2  ;;  %s189_s12 = scalar_lea.vmem %s155_s11, 16  ;;  %s193_s13 = scalar_lea.vmem %s155_s11, 32 }
  0x11   :  { %v122_v7 = vsub.s32 %v119_v6, %v35_v5  ;;  %v72_v10 = vunpack.c.0.s8 %v71_v9  ;;  %v36_v11 = vsub.s32 0, %v35_v5  ;;  %v40_v12 = vsub.s32 1, %v35_v5  ;;  %p190_p5 = scmp.ne.s32.totalorder %s155_s11, %s189_s12  ;;  %p194_p6 = scmp.lt.s32.totalorder %s155_s11, %s155_s11 }
  0x12   :  { %v44_v13 = vsub.s32 2, %v35_v5  ;;  %v48_v14 = vsub.s32 3, %v35_v5  ;;  %v52_v15 = vsub.s32 4, %v35_v5  ;;  %v56_v16 = vsub.s32 5, %v35_v5  ;;  %p195_p7 = scmp.lt.s32.totalorder %s193_s13, %s189_s12 }
  0x13   :  { %v60_v17 = vsub.s32 6, %v35_v5  ;;  %v64_v18 = vsub.s32 7, %v35_v5  ;;  %v75_v20 = vsub.s32 %v72_v10, %v35_v5 }
  0x14   :  { %p196_p8 = por %p195_p7, %p194_p6 }
  0x16   :  { %v29_v46 = vld [vmem:[#allocation2] sm:$0x1]  ;;  %p197_p9 = pnand %p196_p8, %p190_p5 }
  0x99   :  { %v32_v19 = vpop.xlane.xlu0 %31 }
  0x9a   :  { %v37_v21 = vrot.slane %v32_v19, %v36_v11  ;;  %v41_v22 = vrot.slane %v32_v19, %v40_v12  ;;  %v45_v23 = vrot.slane %v32_v19, %v44_v13  ;;  %v49_v24 = vrot.slane %v32_v19, %v48_v14 }
  0x9b   :  { %v53_v25 = vrot.slane %v32_v19, %v52_v15  ;;  %v57_v26 = vrot.slane %v32_v19, %v56_v16  ;;  %v61_v27 = vrot.slane %v32_v19, %v60_v17  ;;  %v65_v28 = vrot.slane %v32_v19, %v64_v18 }
  0x9c   :  { %v66_v29 = vcombine.low %v37_v21, %v41_v22  ;;  %v67_v30 = vcombine.low %v45_v23, %v49_v24 }
  0x9d   :  { %v68_v31 = vcombine.low %v53_v25, %v57_v26  ;;  %v69_v32 = vcombine.low %v61_v27, %v65_v28 }
  0x9e   :  { %v76_v33 = vrot.slane %v66_v29, %v75_v20  ;;  %v83_v34 = vrot.slane %v67_v30, %v75_v20 }
  0x9f   :  { %v90_v35 = vrot.slane %v68_v31, %v75_v20  ;;  %v97_v36 = vrot.slane %v69_v32, %v75_v20 }
  0xa0   :  { %v98_v37 = vcombine.low %v76_v33, %v83_v34 }
  0xa1   :  { %v99_v38 = vcombine.low %v90_v35, %v97_v36 }
  0xa2   :  { %v106_v40 = vrot.slane %v98_v37, %v75_v20 }
  0xa3   :  { %v113_v41 = vrot.slane %v99_v38, %v75_v20 }
  0xa5   :  { %v114_v42 = vcombine.low %v106_v40, %v113_v41 }
  0xa7   :  { %116 = vperm.xlu0 %168, %v114_v42  }
 0x122   :  { %v117_v43 = vpop.permute.xlu0 %116 }
 0x123   :  { %v123_v44 = vrot.slane %v117_v43, %v122_v7 }
 0x125   :  { %v130_v45 = vrot.slane %v123_v44, %v75_v20 }
 0x127   :  { %v137_v47 = vrot.slane %v130_v45, %v75_v20 }
 0x129   :  { %v139_v48 = vadd.f32 %v137_v47, %v29_v46 }
 0x12b   :  { %141 = vst.msk [vmem:[#allocation2] sm:$0x1] %vm25_vm0, %v139_v48 }
 0x132   :  { %v145_v49 = vld [vmem:[#allocation2] sm:$0x1] }
 0x133   :  { %v146_v50 = vmul.f32 0.00390625, %v145_v49 }
 0x135   :  { %147 = vst.msk [vmem:[#allocation6] sm:$0x1] %vm25_vm0, %v146_v50 }
 0x136   :  { %200 = shalt.err (!%p197_p9)
}
 0x137   :  { %157 = dma.vmem_to_hbm [thread:$0]  %s155_s11, 16, %s238_s1, [#allocation5]  }
 0x138   :  { %211 = dma.done.wait [#allocation5], 16  }
 0x139   :  { %212 = vsyncadd [#allocation5], 4294967280 }
 0x13a   :  { %161 = vsyncpa [#allocation4], 1 }
 0x13b   :  { %162 = vsyncpa [#allocation5], 1 }

</bundles_post_ra>
